<compile_context>
chip_gen: v7x
topology: tpu7x:2x2x1
jax: 0.10.0
libtpu: 0.0.40
codegen_flags: <defaults>
</compile_context>

<pallas_src>
import functools

import jax
import jax.numpy as jnp
from jax.experimental import pallas as pl
from jax.experimental.pallas import tpu as pltpu


def _ce_label_smooth_kernel(logits_ref, tgt_ref, out_ref, *, epsilon,
                            num_classes, tile_n, n_actual, needs_mask):
    # logits_ref: (tile_n, C)   tgt_ref: (tile_n, 1) int32   out_ref: (8, 128)
    x = logits_ref[...]                                  # native dtype (bf16 ok)
    tgt = tgt_ref[...]                                   # (tile_n, 1)

    # Row max in the native dtype (exact for bf16), shift + reduce in f32.
    m = jnp.max(x, axis=1, keepdims=True)                # (tile_n, 1)
    shifted = x.astype(jnp.float32) - m.astype(jnp.float32)   # (tile_n, C) f32
    lse = jnp.log(jnp.sum(jnp.exp(shifted), axis=1, keepdims=True))

    # Fused smoothed-CE reduction (single pass over the class axis):
    #   row_loss = lse - sum_j w_j * shifted_j
    #   w_tgt    = (1 - eps) + eps/C,   w_other = eps/C
    one_minus_eps = 1.0 - epsilon            # Python-float constants (hoisted)
    eps_over_c = epsilon / num_classes
    class_iota = jax.lax.broadcasted_iota(jnp.int32, shifted.shape, 1)
    w = jnp.where(class_iota == tgt, one_minus_eps + eps_over_c, eps_over_c)
    row_loss = lse - jnp.sum(w * shifted, axis=1, keepdims=True)  # (tile_n, 1)

    if needs_mask:
        # Zero rows that are batch padding of the (ragged) last tile.  Those
        # rows contain undefined data (no wrapper-side pad); the select
        # discards any NaN/Inf they may have produced.
        row_idx = (pl.program_id(0) * tile_n
                   + jax.lax.broadcasted_iota(jnp.int32, (tile_n, 1), 0))
        row_loss = jnp.where(row_idx < n_actual, row_loss, 0.0)

    partial = jnp.sum(row_loss)
    # Lane-dense partial block; wrapper reads one value per tile.
    out_ref[...] = jnp.broadcast_to(partial, out_ref.shape)


def cross_entropy_label_smooth(logits, targets, *, num_classes, epsilon=0.1,
                               tile_n=None):
    n, c = logits.shape
    assert c == num_classes
    itemsize = jnp.dtype(logits.dtype).itemsize

    if tile_n is None:
        # Per-tile VMEM footprint ~= tile_n * C * (2*itemsize   [double-buffered
        # input tiles] + 3*4 [f32 upcast/shifted/exp temporaries]).  Keep the
        # total near ~10 MiB so it fits v5e's 16 MiB scoped default and v7x's
        # 32 MiB default (64 MiB physical) with headroom; cap rows at 512.
        per_row_bytes = c * (2 * itemsize + 3 * 4)
        budget_bytes = 10 * 1024 * 1024
        tile_n = max(8, min(512, (budget_bytes // per_row_bytes) // 8 * 8))

    n_pad8 = ((n + 7) // 8) * 8
    tile_n = int(min(tile_n, n_pad8))        # don't tile beyond the batch
    # v7x has 2 TensorCores; give the "parallel" batch axis >=2 grid steps
    # whenever there is enough batch to split.
    if tile_n >= 16 and pl.cdiv(n, tile_n) == 1:
        tile_n = max(8, ((tile_n // 2 + 7) // 8) * 8)

    num_tiles = pl.cdiv(n, tile_n)
    needs_mask = (n % tile_n) != 0           # ragged last tile -> mask in-kernel

    tgt = targets.astype(jnp.int32).reshape(n, 1)   # no wrapper-side padding

    kernel = functools.partial(
        _ce_label_smooth_kernel,
        epsilon=float(epsilon), num_classes=int(num_classes),
        tile_n=tile_n, n_actual=n, needs_mask=needs_mask)

    partials = pl.pallas_call(
        kernel,
        out_shape=jax.ShapeDtypeStruct((num_tiles * 8, 128), jnp.float32),
        grid=(num_tiles,),
        in_specs=[
            pl.BlockSpec((tile_n, c), lambda i: (i, 0)),   # logits tile
            pl.BlockSpec((tile_n, 1), lambda i: (i, 0)),   # target indices
        ],
        out_specs=pl.BlockSpec((8, 128), lambda i: (i, 0)),  # per-tile partial
        compiler_params=pltpu.CompilerParams(
            dimension_semantics=("parallel",)),               # megacore-friendly
    )(logits, tgt)

    # One partial per tile (broadcast over its (8,128) block); final reduction
    # and mean-over-batch done here so the grid axis can stay "parallel".
    return jnp.sum(partials[::8, 0]) / jnp.float32(n)


def _reference(logits, targets, *, num_classes, epsilon=0.1):
    log_probs = jax.nn.log_softmax(logits.astype(jnp.float32), axis=1)
    one_hot = jax.nn.one_hot(targets, num_classes, dtype=jnp.float32)
    smoothed = (1.0 - epsilon) * one_hot + epsilon / num_classes
    return jnp.sum(jnp.mean(-smoothed * log_probs, axis=0))


if __name__ == "__main__":
    epsilon = 0.1
    key = jax.random.PRNGKey(0)

    # Test 1: small f32 case, single tile.
    batch, num_classes = 8, 32
    k1, k2, key = jax.random.split(key, 3)
    logits = jax.random.normal(k1, (batch, num_classes), dtype=jnp.float32)
    targets = jax.random.randint(k2, (batch,), 0, num_classes, dtype=jnp.int32)
    loss = jax.block_until_ready(
        cross_entropy_label_smooth(logits, targets, num_classes=num_classes,
                                   epsilon=epsilon))
    ref = _reference(logits, targets, num_classes=num_classes, epsilon=epsilon)
    assert jnp.allclose(loss, ref, rtol=1e-5, atol=1e-5), (loss, ref)

    # Test 2: multi-tile grid with ragged last tile (N=20, tile_n=8), no
    # wrapper-side padding; the in-kernel row mask handles the tail.
    batch, num_classes = 20, 160
    k1, k2, key = jax.random.split(key, 3)
    logits = jax.random.normal(k1, (batch, num_classes), dtype=jnp.float32)
    targets = jax.random.randint(k2, (batch,), 0, num_classes, dtype=jnp.int32)
    loss = jax.block_until_ready(
        cross_entropy_label_smooth(logits, targets, num_classes=num_classes,
                                   epsilon=epsilon, tile_n=8))
    ref = _reference(logits, targets, num_classes=num_classes, epsilon=epsilon)
    assert jnp.allclose(loss, ref, rtol=1e-5, atol=1e-5), (loss, ref)

    # Test 3: bf16 logits (row max in bf16, reductions in f32).
    batch, num_classes = 8, 32
    k1, k2, key = jax.random.split(key, 3)
    logits = jax.random.normal(k1, (batch, num_classes)).astype(jnp.bfloat16)
    targets = jax.random.randint(k2, (batch,), 0, num_classes, dtype=jnp.int32)
    loss = jax.block_until_ready(
        cross_entropy_label_smooth(logits, targets, num_classes=num_classes,
                                   epsilon=epsilon))
    ref = _reference(logits, targets, num_classes=num_classes, epsilon=epsilon)
    assert jnp.allclose(loss, ref, rtol=1e-4, atol=1e-4), (loss, ref)

    print("KERNEL_OK")
</pallas_src>

<mosaic_0001>
module attributes {stable_mosaic.version = 11 : i64} {
  func.func @_ce_label_smooth_kernel(%arg0: i32, %arg1: memref<8x32xf32, #tpu.memory_space<vmem>>, %arg2: memref<8x1xi32, #tpu.memory_space<vmem>>, %arg3: memref<8x128xf32, #tpu.memory_space<vmem>>) attributes {dimension_semantics = [#tpu.dimension_semantics<parallel>], iteration_bounds = array<i64: 1>, scalar_prefetch = 0 : i64, scratch_operands = 0 : i64, tpu.core_type = #tpu.core_type<tc>, window_params = [{transform_indices = @transform_0, window_bounds = array<i64: 8, 32>}, {transform_indices = @transform_1, window_bounds = array<i64: 8, 1>}, {transform_indices = @transform_2, window_bounds = array<i64: 8, 128>}]} {
    %c0 = arith.constant 0 : index
    %c0_0 = arith.constant 0 : index
    %0 = vector.load %arg1[%c0, %c0_0] : memref<8x32xf32, #tpu.memory_space<vmem>>, vector<8x32xf32>
    %c0_1 = arith.constant 0 : index
    %c0_2 = arith.constant 0 : index
    %1 = vector.load %arg2[%c0_1, %c0_2] : memref<8x1xi32, #tpu.memory_space<vmem>>, vector<8x1xi32>
    %cst = arith.constant dense<0xFF800000> : vector<8xf32>
    %2 = vector.multi_reduction <maximumf>, %0, %cst [1] : vector<8x32xf32> to vector<8xf32>
    %3 = vector.shape_cast %2 : vector<8xf32> to vector<8x1xf32>
    %4 = vector.broadcast %3 : vector<8x1xf32> to vector<8x32xf32>
    %5 = arith.subf %0, %4 : vector<8x32xf32>
    %6 = math.exp %5 : vector<8x32xf32>
    %cst_3 = arith.constant dense<0.000000e+00> : vector<8xf32>
    %7 = vector.multi_reduction <add>, %6, %cst_3 [1] : vector<8x32xf32> to vector<8xf32>
    %8 = vector.shape_cast %7 : vector<8xf32> to vector<8x1xf32>
    %9 = math.log %8 : vector<8x1xf32>
    %10 = tpu.iota {dimensions = array<i32: 1>} : vector<8x32xi32>
    %11 = vector.broadcast %1 : vector<8x1xi32> to vector<8x32xi32>
    %12 = arith.cmpi eq, %10, %11 : vector<8x32xi32>
    %cst_4 = arith.constant 0.903124988 : f32
    %cst_5 = arith.constant 3.125000e-03 : f32
    %13 = vector.broadcast %cst_4 : f32 to vector<8x32xf32>
    %14 = vector.broadcast %cst_5 : f32 to vector<8x32xf32>
    %15 = arith.select %12, %13, %14 : vector<8x32xi1>, vector<8x32xf32>
    %16 = arith.mulf %15, %5 : vector<8x32xf32>
    %cst_6 = arith.constant dense<0.000000e+00> : vector<8xf32>
    %17 = vector.multi_reduction <add>, %16, %cst_6 [1] : vector<8x32xf32> to vector<8xf32>
    %18 = vector.shape_cast %17 : vector<8xf32> to vector<8x1xf32>
    %19 = arith.subf %9, %18 : vector<8x1xf32>
    %20 = vector.shape_cast %19 : vector<8x1xf32> to vector<1x8x1xf32>
    %cst_7 = arith.constant dense<0.000000e+00> : vector<1xf32>
    %21 = vector.multi_reduction <add>, %20, %cst_7 [1, 2] : vector<1x8x1xf32> to vector<1xf32>
    %22 = vector.shape_cast %21 : vector<1xf32> to vector<1x1x1xf32>
    %23 = vector.extract %22[0, 0, 0] : f32 from vector<1x1x1xf32>
    %24 = vector.broadcast %23 : f32 to vector<8x128xf32>
    %c0_8 = arith.constant 0 : index
    %c0_9 = arith.constant 0 : index
    %25 = vector.load %arg3[%c0_8, %c0_9] : memref<8x128xf32, #tpu.memory_space<vmem>>, vector<8x128xf32>
    tpu.vector_store %arg3[%c0_8, %c0_9], %24 {strides = array<i32>} : memref<8x128xf32, #tpu.memory_space<vmem>>, vector<8x128xf32>,
    return
  }
  func.func @transform_0(%arg0: i32) -> (i32, i32) {
    %c0_i32 = arith.constant 0 : i32
    %c0_i32_0 = arith.constant 0 : i32
    return %arg0, %c0_i32 : i32, i32
  }
  func.func @transform_1(%arg0: i32) -> (i32, i32) {
    %c0_i32 = arith.constant 0 : i32
    %c0_i32_0 = arith.constant 0 : i32
    return %arg0, %c0_i32 : i32, i32
  }
  func.func @transform_2(%arg0: i32) -> (i32, i32) {
    %c0_i32 = arith.constant 0 : i32
    %c0_i32_0 = arith.constant 0 : i32
    return %arg0, %c0_i32 : i32, i32
  }
}

</mosaic_0001>

<bundles_post_ra>
// kernel: tpu_custom_call.1
= control target key start
LH: loop header
LB: loop body
LE: loop exit
PB: predicated region body
PF: predicated region fallthrough
CT: control target
= control target key end

     0   :  { %vm14_vm0 = vcmask 261120   ;;  %s138_s0 = inlined_call_operand.vmem [shape: f32[8,32], index: 0, kind: input, shape index: {}]   ;;  %s139_s1 = inlined_call_operand.vmem [shape: s32[8,1], index: 1, kind: input, shape index: {}]   ;;  %s140_s2 = inlined_call_operand.hbm [shape: f32[8,128], index: 2, kind: output, shape index: {}]  }
   0x1   :  { %v12_v0 = vld [vmem:[%s138_s0] sm:$0xff] }
   0x2   :  { %7 = vsyncpa [#allocation3], 0  ;;  %v15_v1 = vsel %vm14_vm0, %v12_v0, -inf  ;;  %v99_v2 = vmov 0   ;;  %v13_v3 = vld [vmem:[%s139_s1] sm:$0xff]  ;;  %v26_v6 = vlaneseq  ;;  %vm38_vm2 = vcmask 7168  }
   0x3   :  { %70 = vset.pattern.permute.xlu0 %v99_v2  ;;  %v100_v10 = vmov 0.003125   ;;  %s101_s0 = smov [#allocation2]  }
   0x4   :  { %16 = vmax.xlane.f32.xlu0 %v15_v1  ;;  %v27_v8 = vand.u32 127, %v26_v6  ;;  %s57_s1 = sshll.u32 %s101_s0, 4  ;;  %s58_s1 = int_to_ptr.vmem [resolvable:$true] %s57_s1 }
   0x5   :  { %s75_s14 = scalar_lea.vmem %s58_s1, 128  ;;  %p80_p1 = scmp.lt.s32.totalorder %s58_s1, %s58_s1 }
   0x6   :  { %p76_p0 = scmp.ne.s32.totalorder %s58_s1, %s75_s14  ;;  %p81_p2 = scmp.lt.s32.totalorder %s75_s14, %s75_s14 }
   0x8   :  { %p82_p3 = por %p81_p2, %p80_p1 }
   0xa   :  { %p83_p4 = pnand %p82_p3, %p76_p0 }
  0x1a   :  { %29 = vperm.xlu0 %70, %v13_v3  }
  0x91   :  { %v17_v4 = vpop.xlane.xlu0 %16 }
  0x92   :  { %v18_v5 = vsub.f32 %v12_v0, %v17_v4 }
  0x94   :  { %v19_v7 = vmul.f32 1.442695, %v18_v5 }
  0x96   :  { %71 = vpow2.f32 %v19_v7 }
  0x99   :  { %v30_v9 = vpop.permute.xlu0 %29 }
  0x9a   :  { %vm31_vm1 = vcmp.eq.s32.totalorder %v27_v8, %v30_v9 }
  0x9b   :  { %v32_v11 = vsel %vm31_vm1, 0.903125, %v100_v10 }
  0x9c   :  { %v33_v14 = vmul.f32 %v32_v11, %v18_v5 }
  0x9e   :  { %v34_v15 = vsel %vm14_vm0, %v33_v14, 0.0 }
  0xa0   :  { %v72_v12 = vpop.eup %71 }
  0xa1   :  { %v21_v13 = vsel %vm14_vm0, %v72_v12, 0.0 }
  0xa2   :  { %22 = vadd.xlane.f32.xlu1 %v21_v13 }
  0xa6   :  { %35 = vadd.xlane.f32.xlu1 %v34_v15 }
 0x12f   :  { %v23_v16 = vpop.xlane.xlu1 %22 }
 0x130   :  { %73 = vlog2.f32 %v23_v16 }
 0x133   :  { %v36_v19 = vpop.xlane.xlu1 %35 }
 0x13a   :  { %v74_v17 = vpop.eup %73 }
 0x13b   :  { %v25_v18 = vmul.f32 0.6931472, %v74_v17 }
 0x13d   :  { %v37_v20 = vsub.f32 %v25_v18, %v36_v19 }
 0x13f   :  { %v39_v21 = vsel %vm38_vm2, %v37_v20, 0.0 }
 0x140   :  { %40 = vadd.xlane.f32.xlu1 %v39_v21 }
 0x1cd   :  { %v41_v22 = vpop.xlane.xlu1 %40 }
 0x1ce   :  { %v42_v23 = vrot.slane %v41_v22, 4 }
 0x1d0   :  { %v43_v24 = vadd.f32 %v42_v23, %v41_v22 }
 0x1d2   :  { %v44_v25 = vrot.slane %v43_v24, 2 }
 0x1d4   :  { %v45_v26 = vadd.f32 %v44_v25, %v43_v24 }
 0x1d6   :  { %v46_v27 = vrot.slane %v45_v26, 1 }
 0x1d8   :  { %v47_v28 = vadd.f32 %v46_v27, %v45_v26 }
 0x1da   :  { %65 = vpush %v47_v28 }
 0x20b   :  { %s66_s13 = spop %65 }
 0x20c   :  { %v49_v29 = vstv %s66_s13 }
 0x20d   :  { %50 = vst [vmem:[#allocation2] sm:$0xff] %v49_v29 }
 0x20e   :  { %86 = shalt.err (!%p83_p4)
}
 0x20f   :  { %s87_s17 = scalar_lea.hbm %s140_s2, 128 }
 0x210   :  { %p88_p5 = scmp.ne.s32.totalorder %s140_s2, %s87_s17  ;;  %p91_p6 = scmp.lt.u32.totalorder %s87_s17, %s140_s2 }
 0x212   :  { %p93_p7 = pnand %p91_p6, %p88_p5 }
 0x214   :  { %96 = shalt.err (!%p93_p7)
}
 0x215   :  { %60 = dma.vmem_to_hbm [thread:$0]  %s58_s1, 128, %s140_s2, [#allocation3]  }
 0x216   :  { %97 = dma.done.wait [#allocation3], 128  }
 0x217   :  { %98 = vsyncadd [#allocation3], 4294967168 }
 0x218   :  { %64 = vsyncpa [#allocation3], 1 }

</bundles_post_ra>
